<compile_context>
chip_gen: v7x
topology: tpu7x:2x2x1
jax: 0.10.0
libtpu: 0.0.40
codegen_flags: <defaults>
</compile_context>

<pallas_src>
import jax
import jax.numpy as jnp
from jax.experimental import pallas as pl
from jax.experimental.pallas import tpu as pltpu

B = 2    # batch
N = 8    # rows / sentences per tree
H = 32   # hidden width (h_in)


# ----------------------------------------------------------------------------
# Kernel: whole batch in one grid step, VPU-only math, single packed output
# ----------------------------------------------------------------------------
def _post_attn_kernel(x_ref, valid_ref, w1_ref, w2_ref, b_ref, out_ref):
    x = x_ref[...]            # (B, N, H)  f32
    valid = valid_ref[...]    # (B, N)     f32 in {0, 1}
    w1 = w1_ref[...]          # (1, H)
    w2 = w2_ref[...]          # (1, H)
    b = b_ref[...]            # (1, 1)

    n_rows = x.shape[1]
    hid = x.shape[2]

    # Attention scores via VPU mul + lane reduce (keeps the MXU off the critical
    # path for these tiny (N<=8, K=32, O=1) operands).
    s = jnp.sum(x * w1[None, :, :], axis=-1)                        # (B, N)   x @ w1
    root_s = jnp.sum(x[:, 0, :] * w2, axis=-1, keepdims=True)       # (B, 1)   x[:,0] @ w2

    # Rows in mask_nonzero get the root-augmented score; other rows collapse to
    # exactly 0, which the reference's masked_fill_(==0, -inf) then removes.
    scores = jnp.where(valid > 0.0, s + root_s + b, 0.0)            # (B, N)
    scores = jnp.where(scores == 0.0, -jnp.inf, scores)             # faithful ==0 quirk

    # Softmax over the row axis (last axis of the (B, N) score tile).
    m = jnp.max(scores, axis=-1, keepdims=True)
    e = jnp.exp(scores - m)
    attn = e * pl.reciprocal(jnp.sum(e, axis=-1, keepdims=True), approx=False)  # (B, N)

    # Weighted pooling: x^T @ attn done as VPU broadcast-mul + sublane reduce.
    pooled = jnp.sum(x * attn[:, :, None], axis=1)                  # (B, H)

    # One packed output slab: [ pooled | attn ]  -> sliced apart in the wrapper.
    out_ref[:, :hid] = pooled
    out_ref[:, hid:hid + n_rows] = attn


# ----------------------------------------------------------------------------
# Wrappers
# ----------------------------------------------------------------------------
def post_attn(x, mask_nonzero, w, b):
    """Post_Attn forward.

    x:            (B, N, H) f32
    mask_nonzero: (batch_idx, row_idx) integer index vectors (as in the PyTorch module)
    w:            (2H, 1) attention weight (rows [:H] act on x, rows [H:] on the root copy)
    b:            (1,)    attention bias
    returns (pooled (B, H), attn (B, N, 1))
    """
    Bv, Nv, Hv = x.shape
    batch_idx, row_idx = mask_nonzero

    # Dense 0/1 row mask — identical forward semantics to the index-based masking.
    valid = jnp.zeros((Bv, Nv), jnp.float32).at[batch_idx, row_idx].set(1.0)

    w = jnp.asarray(w, jnp.float32).reshape(2 * Hv, 1)
    w1 = w[:Hv, 0].reshape(1, Hv)
    w2 = w[Hv:, 0].reshape(1, Hv)
    b2 = jnp.asarray(b, jnp.float32).reshape(1, 1)

    packed = pl.pallas_call(
        _post_attn_kernel,
        out_shape=jax.ShapeDtypeStruct((Bv, Hv + Nv), jnp.float32),
        grid=(1,),
        in_specs=[
            pl.BlockSpec((Bv, Nv, Hv), lambda i: (0, 0, 0)),
            pl.BlockSpec((Bv, Nv), lambda i: (0, 0)),
            pl.BlockSpec((1, Hv), lambda i: (0, 0)),
            pl.BlockSpec((1, Hv), lambda i: (0, 0)),
            pl.BlockSpec((1, 1), lambda i: (0, 0)),
        ],
        out_specs=pl.BlockSpec((Bv, Hv + Nv), lambda i: (0, 0)),
        # Single grid step; if a real batch grid axis were ever reintroduced for large B,
        # it should be marked "parallel" so v7x can shard it across its 2 TensorCores.
        compiler_params=pltpu.CompilerParams(dimension_semantics=("arbitrary",)),
    )(x, valid, w1, w2, b2)

    pooled = packed[:, :Hv]
    attn = packed[:, Hv:].reshape(Bv, Nv, 1)
    return pooled, attn


def post_attn_pair(x_a, x_b, mask_nonzero, w, b):
    """Fuse two Post_Attn applications that share the same weights and mask (the
    sty/cont pattern in the VAE) into ONE pallas_call by stacking along the batch axis."""
    Bv = x_a.shape[0]
    batch_idx, row_idx = mask_nonzero
    stacked = jnp.concatenate([x_a, x_b], axis=0)
    batch2 = jnp.concatenate([batch_idx, batch_idx + Bv], axis=0)
    row2 = jnp.concatenate([row_idx, row_idx], axis=0)
    pooled, attn = post_attn(stacked, (batch2, row2), w, b)
    return (pooled[:Bv], attn[:Bv]), (pooled[Bv:], attn[Bv:])


# ----------------------------------------------------------------------------
# Pure-JAX reference (direct transcription of the PyTorch forward)
# ----------------------------------------------------------------------------
def post_attn_ref(x, mask_nonzero, w, b):
    batch_idx, row_idx = mask_nonzero
    root = jnp.zeros_like(x).at[batch_idx, row_idx, :].set(x[batch_idx, 0, :])
    x_plus = jnp.concatenate([x, root], axis=-1)
    attn = x_plus @ w.reshape(-1, 1) + b                                  # (B, N, 1)
    mask_matrix = attn.at[batch_idx, row_idx, :].set(0.0)
    attn = attn - mask_matrix                                             # 0 at invalid rows
    attn = jnp.where(attn == 0.0, -jnp.inf, attn)                         # masked_fill_(==0, -inf)
    attn = jax.nn.softmax(attn, axis=1)
    pooled = jnp.squeeze(jnp.matmul(jnp.transpose(x, (0, 2, 1)), attn), -1)
    return pooled, attn


# ----------------------------------------------------------------------------
# Demo / self-check
# ----------------------------------------------------------------------------
if __name__ == "__main__":
    key = jax.random.PRNGKey(0)
    kx, kx2, kw, kb = jax.random.split(key, 4)

    x = jax.random.normal(kx, (B, N, H), jnp.float32)
    # simulate zero-padded rows (rows NOT present in mask_nonzero)
    x = x.at[0, 6:, :].set(0.0)
    x = x.at[1, 5:, :].set(0.0)

    valid_rows = jnp.sum(jnp.abs(x), axis=-1) != 0
    mask_nonzero = jnp.nonzero(valid_rows)      # (batch_idx, row_idx), like torch.nonzero

    lim = float(1.0 / (2.0 * H) ** 0.5)
    w = jax.random.uniform(kw, (2 * H, 1), jnp.float32, -lim, lim)
    b = jax.random.uniform(kb, (1,), jnp.float32, -lim, lim)

    # Single Post_Attn forward (one pallas_call for the whole batch).
    pooled, attn = post_attn(x, mask_nonzero, w, b)
    pooled, attn = jax.block_until_ready((pooled, attn))

    pooled_r, attn_r = post_attn_ref(x, mask_nonzero, w, b)
    assert pooled.shape == (B, H) and attn.shape == (B, N, 1)
    assert jnp.allclose(pooled, pooled_r, atol=1e-5, rtol=1e-5)
    assert jnp.allclose(attn, attn_r, atol=1e-5, rtol=1e-5)

    # Fused pair (sty/cont style): two Post_Attn applications in ONE launch.
    x2 = jax.random.normal(kx2, (B, N, H), jnp.float32)
    x2 = x2 * valid_rows[..., None].astype(jnp.float32)
    (p_a, a_a), (p_b, a_b) = post_attn_pair(x, x2, mask_nonzero, w, b)
    p_a, p_b = jax.block_until_ready((p_a, p_b))

    pr_a, ar_a = post_attn_ref(x, mask_nonzero, w, b)
    pr_b, ar_b = post_attn_ref(x2, mask_nonzero, w, b)
    assert jnp.allclose(p_a, pr_a, atol=1e-5, rtol=1e-5)
    assert jnp.allclose(p_b, pr_b, atol=1e-5, rtol=1e-5)
    assert jnp.allclose(a_a, ar_a, atol=1e-5, rtol=1e-5)
    assert jnp.allclose(a_b, ar_b, atol=1e-5, rtol=1e-5)

    print("KERNEL_OK")
</pallas_src>

<mosaic_0001>
module attributes {stable_mosaic.version = 11 : i64} {
  func.func @_post_attn_kernel(%arg0: i32, %arg1: memref<2x8x32xf32, #tpu.memory_space<vmem>>, %arg2: memref<2x8xf32, #tpu.memory_space<vmem>>, %arg3: memref<1x32xf32, #tpu.memory_space<vmem>>, %arg4: memref<1x32xf32, #tpu.memory_space<vmem>>, %arg5: memref<1x1xf32, #tpu.memory_space<vmem>>, %arg6: memref<2x40xf32, #tpu.memory_space<vmem>>) attributes {dimension_semantics = [#tpu.dimension_semantics<arbitrary>], iteration_bounds = array<i64: 1>, scalar_prefetch = 0 : i64, scratch_operands = 0 : i64, tpu.core_type = #tpu.core_type<tc>, window_params = [{pipeline_mode = #tpu.pipeline_mode<synchronous>, transform_indices = @transform_0, window_bounds = array<i64: 2, 8, 32>}, {pipeline_mode = #tpu.pipeline_mode<synchronous>, transform_indices = @transform_1, window_bounds = array<i64: 2, 8>}, {pipeline_mode = #tpu.pipeline_mode<synchronous>, transform_indices = @transform_2, window_bounds = array<i64: 1, 32>}, {pipeline_mode = #tpu.pipeline_mode<synchronous>, transform_indices = @transform_3, window_bounds = array<i64: 1, 32>}, {pipeline_mode = #tpu.pipeline_mode<synchronous>, transform_indices = @transform_4, window_bounds = array<i64: 1, 1>}, {pipeline_mode = #tpu.pipeline_mode<synchronous>, transform_indices = @transform_5, window_bounds = array<i64: 2, 40>}]} {
    %c0 = arith.constant 0 : index
    %c0_0 = arith.constant 0 : index
    %c0_1 = arith.constant 0 : index
    %0 = vector.load %arg1[%c0, %c0_0, %c0_1] : memref<2x8x32xf32, #tpu.memory_space<vmem>>, vector<2x8x32xf32>
    %c0_2 = arith.constant 0 : index
    %c0_3 = arith.constant 0 : index
    %1 = vector.load %arg2[%c0_2, %c0_3] : memref<2x8xf32, #tpu.memory_space<vmem>>, vector<2x8xf32>
    %c0_4 = arith.constant 0 : index
    %c0_5 = arith.constant 0 : index
    %2 = vector.load %arg3[%c0_4, %c0_5] : memref<1x32xf32, #tpu.memory_space<vmem>>, vector<1x32xf32>
    %c0_6 = arith.constant 0 : index
    %c0_7 = arith.constant 0 : index
    %3 = vector.load %arg4[%c0_6, %c0_7] : memref<1x32xf32, #tpu.memory_space<vmem>>, vector<1x32xf32>
    %c0_8 = arith.constant 0 : index
    %c0_9 = arith.constant 0 : index
    %4 = vector.load %arg5[%c0_8, %c0_9] : memref<1x1xf32, #tpu.memory_space<vmem>>, vector<1x1xf32>
    %5 = vector.shape_cast %2 : vector<1x32xf32> to vector<1x1x32xf32>
    %6 = vector.broadcast %5 : vector<1x1x32xf32> to vector<2x8x32xf32>
    %7 = arith.mulf %0, %6 : vector<2x8x32xf32>
    %cst = arith.constant dense<0.000000e+00> : vector<2x8xf32>
    %8 = vector.multi_reduction <add>, %7, %cst [2] : vector<2x8x32xf32> to vector<2x8xf32>
    %9 = vector.extract_strided_slice %0 {offsets = [0, 0, 0], sizes = [2, 1, 32], strides = [1, 1, 1]} : vector<2x8x32xf32> to vector<2x1x32xf32>
    %10 = vector.shape_cast %9 : vector<2x1x32xf32> to vector<2x32xf32>
    %11 = vector.broadcast %3 : vector<1x32xf32> to vector<2x32xf32>
    %12 = arith.mulf %10, %11 : vector<2x32xf32>
    %cst_10 = arith.constant dense<0.000000e+00> : vector<2xf32>
    %13 = vector.multi_reduction <add>, %12, %cst_10 [1] : vector<2x32xf32> to vector<2xf32>
    %14 = vector.shape_cast %13 : vector<2xf32> to vector<2x1xf32>
    %cst_11 = arith.constant 0.000000e+00 : f32
    %15 = vector.broadcast %cst_11 : f32 to vector<2x8xf32>
    %16 = arith.cmpf ogt, %1, %15 : vector<2x8xf32>
    %17 = vector.broadcast %14 : vector<2x1xf32> to vector<2x8xf32>
    %18 = arith.addf %8, %17 : vector<2x8xf32>
    %19 = vector.broadcast %4 : vector<1x1xf32> to vector<2x8xf32>
    %20 = arith.addf %18, %19 : vector<2x8xf32>
    %cst_12 = arith.constant 0.000000e+00 : f32
    %21 = vector.broadcast %cst_12 : f32 to vector<2x8xf32>
    %22 = arith.select %16, %20, %21 : vector<2x8xi1>, vector<2x8xf32>
    %cst_13 = arith.constant 0.000000e+00 : f32
    %23 = vector.broadcast %cst_13 : f32 to vector<2x8xf32>
    %24 = arith.cmpf oeq, %22, %23 : vector<2x8xf32>
    %cst_14 = arith.constant 0xFF800000 : f32
    %25 = vector.broadcast %cst_14 : f32 to vector<2x8xf32>
    %26 = arith.select %24, %25, %22 : vector<2x8xi1>, vector<2x8xf32>
    %cst_15 = arith.constant dense<0xFF800000> : vector<2xf32>
    %27 = vector.multi_reduction <maximumf>, %26, %cst_15 [1] : vector<2x8xf32> to vector<2xf32>
    %28 = vector.shape_cast %27 : vector<2xf32> to vector<2x1xf32>
    %29 = vector.broadcast %28 : vector<2x1xf32> to vector<2x8xf32>
    %30 = arith.subf %26, %29 : vector<2x8xf32>
    %31 = math.exp %30 : vector<2x8xf32>
    %cst_16 = arith.constant dense<0.000000e+00> : vector<2xf32>
    %32 = vector.multi_reduction <add>, %31, %cst_16 [1] : vector<2x8xf32> to vector<2xf32>
    %33 = vector.shape_cast %32 : vector<2xf32> to vector<2x1xf32>
    %34 = tpu.reciprocal %33 : vector<2x1xf32> -> vector<2x1xf32>
    %35 = vector.broadcast %34 : vector<2x1xf32> to vector<2x8xf32>
    %36 = arith.mulf %31, %35 : vector<2x8xf32>
    %37 = vector.shape_cast %36 : vector<2x8xf32> to vector<2x8x1xf32>
    %38 = vector.broadcast %37 : vector<2x8x1xf32> to vector<2x8x32xf32>
    %39 = arith.mulf %0, %38 : vector<2x8x32xf32>
    %cst_17 = arith.constant dense<0.000000e+00> : vector<2x32xf32>
    %40 = vector.multi_reduction <add>, %39, %cst_17 [1] : vector<2x8x32xf32> to vector<2x32xf32>
    %c0_18 = arith.constant 0 : index
    %c0_19 = arith.constant 0 : index
    %41 = vector.load %arg6[%c0_18, %c0_19] : memref<2x40xf32, #tpu.memory_space<vmem>>, vector<2x32xf32>
    tpu.vector_store %arg6[%c0_18, %c0_19], %40 {strides = array<i32>} : memref<2x40xf32, #tpu.memory_space<vmem>>, vector<2x32xf32>,
    %c0_20 = arith.constant 0 : index
    %c32 = arith.constant 32 : index
    %42 = vector.load %arg6[%c0_20, %c32] : memref<2x40xf32, #tpu.memory_space<vmem>>, vector<2x8xf32>
    tpu.vector_store %arg6[%c0_20, %c32], %36 {strides = array<i32>} : memref<2x40xf32, #tpu.memory_space<vmem>>, vector<2x8xf32>,
    return
  }
  func.func @transform_0(%arg0: i32) -> (i32, i32, i32) {
    %c0_i32 = arith.constant 0 : i32
    %c0_i32_0 = arith.constant 0 : i32
    %c0_i32_1 = arith.constant 0 : i32
    %c0_i32_2 = arith.constant 0 : i32
    return %c0_i32, %c0_i32_0, %c0_i32_1 : i32, i32, i32
  }
  func.func @transform_1(%arg0: i32) -> (i32, i32) {
    %c0_i32 = arith.constant 0 : i32
    %c0_i32_0 = arith.constant 0 : i32
    %c0_i32_1 = arith.constant 0 : i32
    return %c0_i32, %c0_i32_0 : i32, i32
  }
  func.func @transform_2(%arg0: i32) -> (i32, i32) {
    %c0_i32 = arith.constant 0 : i32
    %c0_i32_0 = arith.constant 0 : i32
    %c0_i32_1 = arith.constant 0 : i32
    return %c0_i32, %c0_i32_0 : i32, i32
  }
  func.func @transform_3(%arg0: i32) -> (i32, i32) {
    %c0_i32 = arith.constant 0 : i32
    %c0_i32_0 = arith.constant 0 : i32
    %c0_i32_1 = arith.constant 0 : i32
    return %c0_i32, %c0_i32_0 : i32, i32
  }
  func.func @transform_4(%arg0: i32) -> (i32, i32) {
    %c0_i32 = arith.constant 0 : i32
    %c0_i32_0 = arith.constant 0 : i32
    %c0_i32_1 = arith.constant 0 : i32
    return %c0_i32, %c0_i32_0 : i32, i32
  }
  func.func @transform_5(%arg0: i32) -> (i32, i32) {
    %c0_i32 = arith.constant 0 : i32
    %c0_i32_0 = arith.constant 0 : i32
    %c0_i32_1 = arith.constant 0 : i32
    return %c0_i32, %c0_i32_0 : i32, i32
  }
}

</mosaic_0001>

<bundles_post_ra>
// kernel: tpu_custom_call.1
= control target key start
LH: loop header
LB: loop body
LE: loop exit
PB: predicated region body
PF: predicated region fallthrough
CT: control target
= control target key end

     0   :  { %s346_s0 = inlined_call_operand.hbm [shape: f32[2,8,32], index: 0, kind: input, shape index: {}]   ;;  %s347_s1 = inlined_call_operand.vmem [shape: f32[2,8], index: 1, kind: input, shape index: {}]   ;;  %s348_s2 = inlined_call_operand.vmem [shape: f32[1,32], index: 2, kind: input, shape index: {}]   ;;  %s349_s3 = inlined_call_operand.vmem [shape: f32[1,32], index: 3, kind: input, shape index: {}]   ;;  %s350_s4 = inlined_call_operand.<no memory space> [shape: f32[1,1], index: 4, kind: input, shape index: {}]   ;;  %s351_s5 = inlined_call_operand.hbm [shape: f32[2,40], index: 5, kind: output, shape index: {}]  }
   0x1   :  { %v10_v0 = vstv %s350_s4 }
   0x2   :  { %11 = vst [vmem:[#allocation2] sm:$0x1] %v10_v0 }
   0x3   :  { %12 = vsyncpa [#allocation4], 0 }
   0x4   :  { %13 = vsyncpa [#allocation5], 0  ;;  %s255_s20 = smov [#allocation3]   ;;  %s207_s24 = scalar_lea.hbm %s346_s0, 256 }
   0x5   :  { %s19_s21 = sshll.u32 %s255_s20, 4  ;;  %p208_p0 = scmp.ne.s32.totalorder %s346_s0, %s207_s24  ;;  %s20_s21 = int_to_ptr.vmem [resolvable:$true] %s19_s21 }
   0x6   :  { %p211_p1 = scmp.lt.u32.totalorder %s207_s24, %s346_s0 }
   0x8   :  { %p213_p2 = pnand %p211_p1, %p208_p0 }
   0xa   :  { %216 = shalt.err (!%p213_p2)
}
   0xb   :  { %s217_s4 = scalar_lea.vmem %s20_s21, 256  ;;  %p222_p4 = scmp.lt.s32.totalorder %s20_s21, %s20_s21 }
   0xc   :  { %p218_p3 = scmp.ne.s32.totalorder %s20_s21, %s217_s4  ;;  %p223_p5 = scmp.lt.s32.totalorder %s217_s4, %s217_s4 }
   0xe   :  { %p224_p6 = por %p223_p5, %p222_p4 }
  0x10   :  { %p225_p7 = pnand %p224_p6, %p218_p3 }
  0x12   :  { %228 = shalt.err (!%p225_p7)
}
  0x13   :  { %s256_s29 = smov 128   ;;  %s257_s30 = smov 8  }
  0x14   :  { %25 = dma.hbm_to_vmem [thread:$0]  %s346_s0, 256, %s20_s21, [#allocation4], %s256_s29, %s256_s29, %s257_s30  }
  0x15   :  { %251 = dma.done.wait [#allocation4], 256  }
  0x16   :  { %252 = vsyncadd [#allocation4], 4294967040  ;;  %v258_v1 = vmov 0   ;;  %v306_v2 = vld [vmem:[#allocation3 + $0x8] sm:$0xff]  ;;  %v192_v3 = vld [vmem:[%s348_s2] ss:$0 sm:$0xff]  ;;  %v78_v16 = vlaneseq }
  0x17   :  { %201 = vset.pattern.permute.xlu1 %v258_v1  ;;  %202 = vset.pattern.permute.xlu0 %v258_v1  ;;  %vm51_vm0 = vcmask 261120   ;;  %v311_v4 = vld [vmem:[#allocation3] sm:$0xff]  ;;  %v50_v5 = vmul.f32 %v192_v3, %v306_v2  ;;  %v193_v6 = vld [vmem:[%s349_s3] ss:$0 sm:$0xff]  ;;  %vm69_vm1 = vcmask 1041409   ;;  %vm72_vm2 = vcmask 254976  }
  0x18   :  { %v64_v7 = vmul.f32 %v193_v6, %v311_v4  ;;  %v65_v8 = vmul.f32 %v193_v6, %v306_v2  ;;  %v49_v11 = vmul.f32 %v192_v3, %v311_v4  ;;  %v194_v15 = vld [vmem:[#allocation2] ss:$0 sm:$0xff]  ;;  %v79_v17 = vshrl.u32 %v78_v16, 7  ;;  %s260_s3 = smov [#allocation6]  }
  0x19   :  { %v55_v9 = vsel %vm51_vm0, %v50_v5, 0.0  ;;  %v110_v18 = vand.u32 127, %v78_v16  ;;  %v39_v33 = vld [vmem:[%s347_s1] sm:$0x3]  ;;  %vm124_vm4 = vcmask 58368   ;;  %s259_s1 = smov 32  }
  0x1a   :  { %56 = vadd.xlane.f32.xlu1 %v55_v9  ;;  %v68_v10 = vrot.slane %v65_v8, 7  ;;  %v52_v14 = vsel %vm51_vm0, %v49_v11, 0.0  ;;  %v84_v21 = vsub.s32 1, %v79_v17  ;;  %v80_v22 = vsub.s32 0, %v79_v17  ;;  %s183_s12 = sshll.u32 %s260_s3, 4  ;;  %s184_s12 = int_to_ptr.vmem [resolvable:$true] %s183_s12 }
  0x1b   :  { %v113_v19 = vsub.s32 %v110_v18, %v79_v17  ;;  %vm76_vm3 = vcmp.gt.f32.partialorder %v39_v33, 0.0  ;;  %vm175_vm6 = vcmask 320768   ;;  %s229_s13 = scalar_lea.vmem %s184_s12, 32  ;;  %p234_p9 = scmp.lt.s32.totalorder %s184_s12, %s184_s12 }
  0x1c   :  { %v70_v12 = vsel %vm69_vm1, %v68_v10, %v64_v7  ;;  %p230_p8 = scmp.ne.s32.totalorder %s184_s12, %s229_s13  ;;  %p235_p10 = scmp.lt.s32.totalorder %s229_s13, %s229_s13 }
  0x1d   :  { %v73_v13 = vsel %vm72_vm2, %v70_v12, 0.0 }
  0x1e   :  { %74 = vadd.xlane.f32.xlu0 %v73_v13  ;;  %p236_p11 = por %p235_p10, %p234_p9 }
  0x20   :  { %p237_p12 = pnand %p236_p11, %p230_p8 }
  0x22   :  { %53 = vadd.xlane.f32.xlu0 %v52_v14 }
  0x2b   :  { %96 = vperm.xlu1 %201, %v194_v15  }
  0xa7   :  { %v57_v20 = vpop.xlane.xlu1 %56 }
  0xab   :  { %v75_v23 = vpop.xlane.xlu0 %74  ;;  %v97_v25 = vpop.permute.xlu1 %96 }
  0xac   :  { %v85_v24 = vrot.slane %v75_v23, %v84_v21  ;;  %v81_v26 = vrot.slane %v75_v23, %v80_v22 }
  0xae   :  { %v89_v27 = vadd.f32 %v85_v24, %v57_v20 }
  0xaf   :  { %v54_v28 = vpop.xlane.xlu0 %53 }
  0xb0   :  { %v100_v29 = vadd.f32 %v97_v25, %v89_v27  ;;  %v88_v30 = vadd.f32 %v81_v26, %v54_v28 }
  0xb2   :  { %v99_v31 = vadd.f32 %v97_v25, %v88_v30  ;;  %107 = vperm.xlu1 %201, %v100_v29  }
  0xb4   :  { %104 = vperm.xlu0 %202, %v99_v31  }
 0x131   :  { %v108_v32 = vpop.permute.xlu1 %107 }
 0x132   :  { %v118_v35 = vrot.slane %v108_v32, %v113_v19 }
 0x133   :  { %v105_v34 = vpop.permute.xlu0 %104 }
 0x134   :  { %v114_v36 = vrot.slane %v105_v34, %v113_v19 }
 0x136   :  { %v119_v37 = vsel %vm69_vm1, %v118_v35, %v114_v36 }
 0x137   :  { %v121_v38 = vsel %vm76_vm3, %v119_v37, 0.0 }
 0x138   :  { %vm122_vm5 = vcmp.eq.f32.partialorder %v121_v38, 0.0 }
 0x139   :  { %v123_v39 = vsel %vm122_vm5, -inf, %v121_v38 }
 0x13a   :  { %v125_v40 = vsel %vm124_vm4, %v123_v39, -inf }
 0x13b   :  { %126 = vmax.xlane.f32.xlu1 %v125_v40 }
 0x1c8   :  { %v127_v41 = vpop.xlane.xlu1 %126 }
 0x1c9   :  { %v128_v42 = vsub.f32 %v123_v39, %v127_v41 }
 0x1cb   :  { %v129_v43 = vmul.f32 1.442695, %v128_v42 }
 0x1cd   :  { %203 = vpow2.f32 %v129_v43 }
 0x1d7   :  { %v204_v44 = vpop.eup %203 }
 0x1d8   :  { %v131_v45 = vsel %vm124_vm4, %v204_v44, 0.0 }
 0x1d9   :  { %132 = vadd.xlane.f32.xlu0 %v131_v45 }
 0x266   :  { %v133_v46 = vpop.xlane.xlu0 %132 }
 0x267   :  { %205 = vrcp.f32 %v133_v46 }
 0x271   :  { %v206_v47 = vpop.eup %205 }
 0x272   :  { %v135_v48 = vmul.f32 %v206_v47, %v204_v44 }
 0x274   :  { %v139_v49 = vrot.slane %v135_v48, %v80_v22  ;;  %v146_v50 = vrot.slane %v135_v48, %v84_v21 }
 0x276   :  { %141 = vbcast.lane.b32.xlu1 %v139_v49, 256 }
 0x27a   :  { %148 = vbcast.lane.b32.xlu1 %v146_v50, 256 }
 0x27e   :  { %172 = vrot.lane.b32.xlu1 %v135_v48, %s259_s1 }
 0x2e8   :  { %v142_v51 = vpop.permute.xlu1 %141 }
 0x2e9   :  { %v150_v52 = vmul.f32 %v142_v51, %v311_v4 }
 0x2eb   :  { %v152_v53 = vsel %vm51_vm0, %v150_v52, 0.0 }
 0x2ec   :  { %v153_v54 = vrot.slane %v152_v53, 4  ;;  %v149_v55 = vpop.permute.xlu1 %148 }
 0x2ed   :  { %v151_v56 = vmul.f32 %v149_v55, %v306_v2 }
 0x2ee   :  { %v154_v57 = vadd.f32 %v153_v54, %v152_v53 }
 0x2ef   :  { %v159_v58 = vsel %vm51_vm0, %v151_v56, 0.0 }
 0x2f0   :  { %v155_v59 = vrot.slane %v154_v57, 2  ;;  %v160_v60 = vrot.slane %v159_v58, 4  ;;  %v173_v2 = vpop.permute.xlu1 %172 }
 0x2f2   :  { %v156_v61 = vadd.f32 %v155_v59, %v154_v57  ;;  %v161_v62 = vadd.f32 %v160_v60, %v159_v58 }
 0x2f4   :  { %v162_v63 = vrot.slane %v161_v62, 2  ;;  %v157_v0 = vrot.slane %v156_v61, 1 }
 0x2f6   :  { %v163_v1 = vadd.f32 %v162_v63, %v161_v62  ;;  %v158_v4 = vadd.f32 %v157_v0, %v156_v61 }
 0x2f8   :  { %v164_v3 = vrot.slane %v163_v1, 1 }
 0x2fa   :  { %v165_v5 = vadd.f32 %v164_v3, %v163_v1 }
 0x2fc   :  { %v168_v6 = vsel %vm69_vm1, %v165_v5, %v158_v4 }
 0x2fd   :  { %170 = vst.msk [vmem:[#allocation6] sm:$0x3] %vm72_vm2, %v168_v6 }
 0x2fe   :  { %176 = vst.msk [vmem:[#allocation6] sm:$0x3] %vm175_vm6, %v173_v2 }
 0x2ff   :  { %240 = shalt.err (!%p237_p12)
}
 0x300   :  { %s241_s16 = scalar_lea.hbm %s351_s5, 32 }
 0x301   :  { %p242_p13 = scmp.ne.s32.totalorder %s351_s5, %s241_s16  ;;  %p245_p0 = scmp.lt.u32.totalorder %s241_s16, %s351_s5 }
 0x303   :  { %p247_p1 = pnand %p245_p0, %p242_p13 }
 0x305   :  { %250 = shalt.err (!%p247_p1)
}
 0x306   :  { %186 = dma.vmem_to_hbm [thread:$0]  %s184_s12, 32, %s351_s5, [#allocation5]  }
 0x307   :  { %253 = dma.done.wait [#allocation5], 32  }
 0x308   :  { %254 = vsyncadd [#allocation5], 4294967264 }
 0x309   :  { %190 = vsyncpa [#allocation4], 1 }
 0x30a   :  { %191 = vsyncpa [#allocation5], 1 }

</bundles_post_ra>
